<compile_context>
chip_gen: v7x
topology: tpu7x:2x2x1
jax: 0.10.0
libtpu: 0.0.40
codegen_flags: <defaults>
</compile_context>

<pallas_src>
import functools

import jax
import jax.numpy as jnp
from jax.experimental import pallas as pl
from jax.experimental.pallas import tpu as pltpu

LANES = 128
SUBLANES = 8


def _round_up(x: int, m: int) -> int:
    return ((x + m - 1) // m) * m


def _mse_kernel(o_ref, y_ref, out_ref, acc_ref, *, block_rows):
    k = pl.program_id(1)

    @pl.when(k == 0)
    def _():
        acc_ref[...] = jnp.zeros_like(acc_ref)

    d = o_ref[...].astype(jnp.float32) - y_ref[...].astype(jnp.float32)
    dd = d * d
    # Fold the (block_rows, 128) tile into the fixed (8, 128) accumulator.
    # reshape is a contiguous sublane regrouping; the sum over axis 0 is
    # vreg-to-vreg VALU adds (no cross-lane work).
    acc_ref[...] += jnp.sum(dd.reshape(block_rows // SUBLANES, SUBLANES, LANES), axis=0)

    @pl.when(k == pl.num_programs(1) - 1)
    def _():
        out_ref[0, 0] = jnp.sum(acc_ref[...])


def mse_loss_pallas(o, y, *, block_rows: int = 512, num_partials: int = 2):
    """mean((o - y)**2) computed in f32, Pallas TPU kernel."""
    assert o.shape == y.shape
    n_elems = int(o.size)

    # Lane-dense slab: flatten and view as (rows, 128).
    rows = -(-n_elems // LANES)                       # cdiv
    block_rows = max(SUBLANES, min(block_rows, _round_up(rows, SUBLANES)))
    block_rows = _round_up(block_rows, SUBLANES)

    num_blocks = -(-rows // block_rows)               # cdiv
    P = max(1, min(num_partials, num_blocks))         # partial sums (>=2 -> both TCs on v7x)
    K = -(-num_blocks // P)                           # blocks per partial
    rows_pad = P * K * block_rows
    n_pad = rows_pad * LANES

    o_flat = jnp.ravel(o)
    y_flat = jnp.ravel(y)
    if n_pad != n_elems:
        # Zero padding is exact for MSE: (0 - 0)^2 contributes nothing; we
        # divide by the true element count below.
        o_flat = jnp.pad(o_flat, (0, n_pad - n_elems))
        y_flat = jnp.pad(y_flat, (0, n_pad - n_elems))
    o2 = o_flat.reshape(rows_pad, LANES)
    y2 = y_flat.reshape(rows_pad, LANES)

    kernel = functools.partial(_mse_kernel, block_rows=block_rows)

    partials = pl.pallas_call(
        kernel,
        out_shape=jax.ShapeDtypeStruct((P, 1), jnp.float32),
        grid_spec=pltpu.PrefetchScalarGridSpec(
            num_scalar_prefetch=0,
            grid=(P, K),
            in_specs=[
                pl.BlockSpec((block_rows, LANES), lambda p, k: (p * K + k, 0)),
                pl.BlockSpec((block_rows, LANES), lambda p, k: (p * K + k, 0)),
            ],
            out_specs=pl.BlockSpec(
                (1, 1), lambda p, k: (p, 0), memory_space=pltpu.SMEM
            ),
            scratch_shapes=[pltpu.VMEM((SUBLANES, LANES), jnp.float32)],
        ),
        compiler_params=pltpu.CompilerParams(
            dimension_semantics=("parallel", "arbitrary"),
        ),
    )(o2, y2)

    return jnp.sum(partials) / jnp.float32(n_elems)


class LossAdaptiveClusteringV2:
    """JAX/Pallas port of Loss_AdaptiveClusteringv2 (forward = MSE(o, y))."""

    def __init__(self, num_classes: int):
        self.num_classes = num_classes
        self.margin = 1  # unused in forward, kept for parity

    def __call__(self, o, y):
        return mse_loss_pallas(o, y)


if __name__ == "__main__":
    key = jax.random.PRNGKey(0)

    # --- Case 1: module-like small shapes (batch=16, num_classes=32) ---------
    num_classes, batch = 32, 16
    k_o, k_y, k2_o, k2_y = jax.random.split(key, 4)
    o = jax.random.normal(k_o, (batch, num_classes), dtype=jnp.float32)
    labels = jax.random.randint(k_y, (batch,), 0, num_classes)
    y = jax.nn.one_hot(labels, num_classes, dtype=jnp.float32)

    loss_mod = LossAdaptiveClusteringV2(num_classes)
    loss = jax.block_until_ready(loss_mod(o, y))
    ref = jnp.mean((o.astype(jnp.float32) - y.astype(jnp.float32)) ** 2)
    assert jnp.allclose(loss, ref, rtol=1e-5, atol=1e-6), (loss, ref)

    # --- Case 2: non-divisible sizes, exercises padding + multi-block + 2 partials
    b2, c2 = 300, 100
    o2 = jax.random.normal(k2_o, (b2, c2), dtype=jnp.float32)
    y2 = jax.random.normal(k2_y, (b2, c2), dtype=jnp.float32)
    loss2 = jax.block_until_ready(
        mse_loss_pallas(o2, y2, block_rows=64, num_partials=2)
    )
    ref2 = jnp.mean((o2 - y2) ** 2)
    assert jnp.allclose(loss2, ref2, rtol=1e-5, atol=1e-6), (loss2, ref2)

    print("KERNEL_OK")
</pallas_src>

<mosaic_0001>
module attributes {stable_mosaic.version = 11 : i64} {
  func.func @_mse_kernel(%arg0: i32, %arg1: i32, %arg2: memref<8x128xf32, #tpu.memory_space<vmem>>, %arg3: memref<8x128xf32, #tpu.memory_space<vmem>>, %arg4: memref<1x1xf32, #tpu.memory_space<smem>>, %arg5: memref<8x128xf32, #tpu.memory_space<vmem>>) attributes {dimension_semantics = [#tpu.dimension_semantics<parallel>, #tpu.dimension_semantics<arbitrary>], iteration_bounds = array<i64: 1, 1>, scalar_prefetch = 0 : i64, scratch_operands = 1 : i64, tpu.core_type = #tpu.core_type<tc>, window_params = [{transform_indices = @transform_0, window_bounds = array<i64: 8, 128>}, {transform_indices = @transform_1, window_bounds = array<i64: 8, 128>}, {transform_indices = @transform_2, window_bounds = array<i64: 1, 1>}]} {
    %c0_i32 = arith.constant 0 : i32
    %0 = arith.cmpi eq, %arg1, %c0_i32 : i32
    %1 = arith.extui %0 : i1 to i32
    %c0_i32_0 = arith.constant 0 : i32
    %2 = arith.cmpi ne, %1, %c0_i32_0 : i32
    scf.if %2 {
      %cst_10 = arith.constant 0.000000e+00 : f32
      %15 = vector.broadcast %cst_10 : f32 to vector<8x128xf32>
      %c0_11 = arith.constant 0 : index
      %c0_12 = arith.constant 0 : index
      %16 = vector.load %arg5[%c0_11, %c0_12] : memref<8x128xf32, #tpu.memory_space<vmem>>, vector<8x128xf32>
      tpu.vector_store %arg5[%c0_11, %c0_12], %15 {strides = array<i32>} : memref<8x128xf32, #tpu.memory_space<vmem>>, vector<8x128xf32>,
    } else {
    }
    %c0 = arith.constant 0 : index
    %c0_1 = arith.constant 0 : index
    %3 = vector.load %arg2[%c0, %c0_1] : memref<8x128xf32, #tpu.memory_space<vmem>>, vector<8x128xf32>
    %c0_2 = arith.constant 0 : index
    %c0_3 = arith.constant 0 : index
    %4 = vector.load %arg3[%c0_2, %c0_3] : memref<8x128xf32, #tpu.memory_space<vmem>>, vector<8x128xf32>
    %5 = arith.subf %3, %4 : vector<8x128xf32>
    %6 = arith.mulf %5, %5 : vector<8x128xf32>
    %c0_4 = arith.constant 0 : index
    %c0_5 = arith.constant 0 : index
    %7 = vector.load %arg5[%c0_4, %c0_5] : memref<8x128xf32, #tpu.memory_space<vmem>>, vector<8x128xf32>
    %8 = vector.shape_cast %6 : vector<8x128xf32> to vector<1x8x128xf32>
    %cst = arith.constant dense<0.000000e+00> : vector<8x128xf32>
    %9 = vector.multi_reduction <add>, %8, %cst [0] : vector<1x8x128xf32> to vector<8x128xf32>
    %10 = arith.addf %7, %9 : vector<8x128xf32>
    %c0_6 = arith.constant 0 : index
    %c0_7 = arith.constant 0 : index
    %11 = vector.load %arg5[%c0_6, %c0_7] : memref<8x128xf32, #tpu.memory_space<vmem>>, vector<8x128xf32>
    tpu.vector_store %arg5[%c0_6, %c0_7], %10 {strides = array<i32>} : memref<8x128xf32, #tpu.memory_space<vmem>>, vector<8x128xf32>,
    %c0_i32_8 = arith.constant 0 : i32
    %12 = arith.cmpi eq, %arg1, %c0_i32_8 : i32
    %13 = arith.extui %12 : i1 to i32
    %c0_i32_9 = arith.constant 0 : i32
    %14 = arith.cmpi ne, %13, %c0_i32_9 : i32
    scf.if %14 {
      %c0_10 = arith.constant 0 : index
      %c0_11 = arith.constant 0 : index
      %15 = vector.load %arg5[%c0_10, %c0_11] : memref<8x128xf32, #tpu.memory_space<vmem>>, vector<8x128xf32>
      %16 = vector.shape_cast %15 : vector<8x128xf32> to vector<1x8x128xf32>
      %cst_12 = arith.constant dense<0.000000e+00> : vector<1xf32>
      %17 = vector.multi_reduction <add>, %16, %cst_12 [1, 2] : vector<1x8x128xf32> to vector<1xf32>
      %18 = vector.shape_cast %17 : vector<1xf32> to vector<1x1x1xf32>
      %19 = vector.extract %18[0, 0, 0] : f32 from vector<1x1x1xf32>
      %c0_13 = arith.constant 0 : index
      %c0_14 = arith.constant 0 : index
      %20 = memref.load %arg4[%c0_13, %c0_14] : memref<1x1xf32, #tpu.memory_space<smem>>
      memref.store %19, %arg4[%c0_13, %c0_14] : memref<1x1xf32, #tpu.memory_space<smem>>
    } else {
    }
    return
  }
  func.func @transform_0(%arg0: i32, %arg1: i32) -> (i32, i32) {
    %c1_i32 = arith.constant 1 : i32
    %0 = arith.muli %arg0, %c1_i32 : i32
    %1 = arith.addi %0, %arg1 : i32
    %c0_i32 = arith.constant 0 : i32
    %c0_i32_0 = arith.constant 0 : i32
    return %1, %c0_i32 : i32, i32
  }
  func.func @transform_1(%arg0: i32, %arg1: i32) -> (i32, i32) {
    %c1_i32 = arith.constant 1 : i32
    %0 = arith.muli %arg0, %c1_i32 : i32
    %1 = arith.addi %0, %arg1 : i32
    %c0_i32 = arith.constant 0 : i32
    %c0_i32_0 = arith.constant 0 : i32
    return %1, %c0_i32 : i32, i32
  }
  func.func @transform_2(%arg0: i32, %arg1: i32) -> (i32, i32) {
    %c0_i32 = arith.constant 0 : i32
    %c0_i32_0 = arith.constant 0 : i32
    return %arg0, %c0_i32 : i32, i32
  }
}

</mosaic_0001>

<bundles_post_ra>
// kernel: tpu_custom_call.1
= control target key start
LH: loop header
LB: loop body
LE: loop exit
PB: predicated region body
PF: predicated region fallthrough
CT: control target
= control target key end

     0   :  { %7 = vsyncpa [#allocation4], 0  ;;  %s206_s0 = inlined_call_operand.hbm [shape: f32[8,128], index: 0, kind: input, shape index: {}]   ;;  %s207_s1 = inlined_call_operand.hbm [shape: f32[8,128], index: 1, kind: input, shape index: {}]   ;;  %s208_s2 = inlined_call_operand.hbm [shape: f32[1,1], index: 2, kind: output, shape index: {}]  }
   0x1   :  { %8 = vsyncpa [#allocation7], 0 }
   0x2   :  { %9 = vsyncpa [#allocation5], 0  ;;  %s152_s9 = smov [#allocation3]   ;;  %s153_s11 = smov [#allocation6]  }
   0x3   :  { %s19_s10 = sshll.u32 %s152_s9, 4  ;;  %s32_s12 = sshll.u32 %s153_s11, 4  ;;  %s20_s10 = int_to_ptr.vmem [resolvable:$true] %s19_s10  ;;  %s33_s12 = int_to_ptr.vmem [resolvable:$true] %s32_s12 }
   0x4   :  { %s92_s15 = scalar_lea.hbm %s206_s0, 128 }
   0x5   :  { %p93_p0 = scmp.ne.s32.totalorder %s206_s0, %s92_s15  ;;  %p96_p1 = scmp.lt.u32.totalorder %s92_s15, %s206_s0 }
   0x7   :  { %p98_p2 = pnand %p96_p1, %p93_p0 }
   0x9   :  { %101 = shalt.err (!%p98_p2)
}
   0xa   :  { %s102_s20 = scalar_lea.vmem %s20_s10, 128  ;;  %p107_p4 = scmp.lt.s32.totalorder %s20_s10, %s20_s10 }
   0xb   :  { %p103_p3 = scmp.ne.s32.totalorder %s20_s10, %s102_s20  ;;  %p108_p5 = scmp.lt.s32.totalorder %s102_s20, %s102_s20 }
   0xd   :  { %p109_p6 = por %p108_p5, %p107_p4 }
   0xf   :  { %p110_p7 = pnand %p109_p6, %p103_p3 }
  0x11   :  { %113 = shalt.err (!%p110_p7)
}
  0x12   :  { %22 = dma.hbm_to_vmem [thread:$0]  %s206_s0, 128, %s20_s10, [#allocation4]  }
  0x13   :  { %s114_s25 = scalar_lea.hbm %s207_s1, 128 }
  0x14   :  { %p115_p8 = scmp.ne.s32.totalorder %s207_s1, %s114_s25  ;;  %p118_p9 = scmp.lt.u32.totalorder %s114_s25, %s207_s1 }
  0x16   :  { %p120_p10 = pnand %p118_p9, %p115_p8 }
  0x18   :  { %123 = shalt.err (!%p120_p10)
}
  0x19   :  { %s124_s30 = scalar_lea.vmem %s33_s12, 128  ;;  %p129_p12 = scmp.lt.s32.totalorder %s33_s12, %s33_s12 }
  0x1a   :  { %p125_p11 = scmp.ne.s32.totalorder %s33_s12, %s124_s30  ;;  %p130_p13 = scmp.lt.s32.totalorder %s124_s30, %s124_s30 }
  0x1c   :  { %p131_p0 = por %p130_p13, %p129_p12 }
  0x1e   :  { %p132_p1 = pnand %p131_p0, %p125_p11 }
  0x20   :  { %135 = shalt.err (!%p132_p1)
}
  0x21   :  { %35 = dma.hbm_to_vmem [thread:$0]  %s207_s1, 128, %s33_s12, [#allocation7]  }
  0x22   :  { %146 = dma.done.wait [#allocation4], 128  }
  0x23   :  { %147 = vsyncadd [#allocation4], 4294967168 }
  0x24   :  { %148 = dma.done.wait [#allocation7], 128  }
  0x25   :  { %149 = vsyncadd [#allocation7], 4294967168  ;;  %v49_v0 = vld [vmem:[#allocation3] sm:$0xff]  ;;  %v50_v1 = vld [vmem:[#allocation6] sm:$0xff]  ;;  %s136_s6 = scalar_lea.hbm %s208_s2, 16 }
  0x26   :  { %v51_v2 = vsub.f32 %v49_v0, %v50_v1  ;;  %p137_p2 = scmp.ne.s32.totalorder %s208_s2, %s136_s6  ;;  %p140_p3 = scmp.lt.u32.totalorder %s136_s6, %s208_s2 }
  0x28   :  { %v52_v3 = vmul.f32 %v51_v2, %v51_v2  ;;  %p142_p4 = pnand %p140_p3, %p137_p2 }
  0x2a   :  { %61 = vadd.xlane.f32.xlu0 %v52_v3 }
  0xb7   :  { %v62_v4 = vpop.xlane.xlu0 %61 }
  0xb8   :  { %v63_v5 = vrot.slane %v62_v4, 4 }
  0xba   :  { %v64_v6 = vadd.f32 %v63_v5, %v62_v4 }
  0xbc   :  { %v65_v7 = vrot.slane %v64_v6, 2 }
  0xbe   :  { %v66_v8 = vadd.f32 %v65_v7, %v64_v6 }
  0xc0   :  { %v67_v9 = vrot.slane %v66_v8, 1 }
  0xc2   :  { %v68_v10 = vadd.f32 %v67_v9, %v66_v8 }
  0xc4   :  { %87 = vpush %v68_v10 }
  0xf5   :  { %s88_s4 = spop %87 }
  0xf6   :  { %71 = sst [smem:[#allocation8]] %s88_s4 }
  0xf7   :  { %145 = shalt.err (!%p142_p4)
}
  0xf8   :  { %s154_s11 = smov [#allocation8]  }
  0xf9   :  { %79 = dma.smem_to_hbm %s154_s11, 16, %s208_s2, [#allocation5]  }
  0xfa   :  { %150 = dma.done.wait [#allocation5], 16  }
  0xfb   :  { %151 = vsyncadd [#allocation5], 4294967280 }
  0xfc   :  { %83 = sfence }
  0xfd   :  { %84 = vsyncpa [#allocation4], 1 }
  0xfe   :  { %85 = vsyncpa [#allocation7], 1 }
  0xff   :  { %86 = vsyncpa [#allocation5], 1 }

</bundles_post_ra>
